<compile_context>
chip_gen: v6e
topology: v6e:2x2x1
jax: 0.10.0
libtpu: 0.0.40
codegen_flags: <defaults>
</compile_context>

<pallas_src>
import jax
import jax.numpy as jnp
from jax.experimental import pallas as pl
from jax.experimental.pallas import tpu as pltpu

C_OUT = 3
KH = KW = 3


def _make_kernel(N, H, W):
    Wp = W + 2                # padded width of one image
    SLAB_W = N * Wp           # N padded images packed along the lane axis
    ACC_W = SLAB_W - 2        # widest shifted tap slice that stays in bounds

    def kernel(w_ref, b_ref, x_ref, o_ref):
        # w_ref: SMEM (27,)  flattened (co, kh, kw) weights (C_in == 1)
        # b_ref: SMEM (3,)   bias
        # x_ref: VMEM (N, H, W)         whole (unpadded) batch
        # o_ref: VMEM (N*C_OUT, H, W)   output planes, n-major / channel-minor

        x = x_ref[...]                                        # (N, H, W) f32

        # --- build the zero-padded, lane-packed slab in registers (no HBM pad) ---
        zc = jnp.zeros((H, 1), dtype=jnp.float32)
        pieces = []
        for n in range(N):
            pieces += [zc, x[n], zc]                          # 1-col zero halo per image
        body = jnp.concatenate(pieces, axis=1)                # (H, SLAB_W)
        zr = jnp.zeros((1, SLAB_W), dtype=jnp.float32)
        xp = jnp.concatenate([zr, body, zr], axis=0)          # (H+2, SLAB_W)

        # --- 3x3 conv as 9 shifted MACs; each tap slice shared by all 3 channels ---
        acc = [jnp.full((H, ACC_W), b_ref[co], dtype=jnp.float32) for co in range(C_OUT)]
        for kh in range(KH):
            for kw in range(KW):
                tap = xp[kh:kh + H, kw:kw + ACC_W]            # (H, ACC_W), hoisted slice
                for co in range(C_OUT):
                    acc[co] = acc[co] + w_ref[co * (KH * KW) + kh * KW + kw] * tap

        # --- Mish with a single transcendental per element, computed on the dense slab ---
        for co in range(C_OUT):
            a = acc[co]
            t = jnp.exp(jnp.minimum(a, 20.0))                 # single EUP exp
            num = t * (t + 2.0)                               # e^{2*sp} - 1,  sp = softplus(a)
            den = num + 2.0                                   # e^{2*sp} + 1   (>= 2, never 0)
            r = pl.reciprocal(den, approx=True)
            r = r * (2.0 - den * r)                           # one Newton step -> ~f32 accuracy
            y = jnp.where(a > 20.0, a, a * num * r)           # (H, ACC_W)
            # slice the valid W columns of every image for this channel; static stores
            for n in range(N):
                c0 = n * Wp
                o_ref[n * C_OUT + co] = y[:, c0:c0 + W]       # (H, W) plane

    return kernel


def conv_mish(x_nchw, weight, bias):
    """x_nchw: (N, 1, H, W) f32; weight: (3, 1, 3, 3) f32; bias: (3,) f32 -> (N, 3, H, W) f32."""
    N, C_in, H, W = x_nchw.shape
    assert C_in == 1
    x = x_nchw.reshape(N, H, W).astype(jnp.float32)           # drop singleton channel (free)
    w_flat = weight.reshape(-1).astype(jnp.float32)           # (27,)
    b = bias.astype(jnp.float32)                              # (3,)

    cost = pl.CostEstimate(
        flops=2 * KH * KW * N * C_OUT * H * W,
        transcendentals=N * C_OUT * H * W,                    # one exp per output element
        bytes_accessed=4 * (x.size + N * C_OUT * H * W + w_flat.size + b.size),
    )

    out = pl.pallas_call(
        _make_kernel(N, H, W),
        out_shape=jax.ShapeDtypeStruct((N * C_OUT, H, W), jnp.float32),
        grid_spec=pltpu.PrefetchScalarGridSpec(
            num_scalar_prefetch=0,
            grid=(1,),                                        # whole batch in one fat step
            in_specs=[
                pl.BlockSpec(memory_space=pltpu.MemorySpace.SMEM),   # weights (whole, scalar path)
                pl.BlockSpec(memory_space=pltpu.MemorySpace.SMEM),   # bias (whole, scalar path)
                pl.BlockSpec((N, H, W), lambda i: (0, 0, 0)),        # full-batch VMEM block
            ],
            out_specs=pl.BlockSpec((N * C_OUT, H, W), lambda i: (0, 0, 0)),
        ),
        compiler_params=pltpu.CompilerParams(dimension_semantics=("arbitrary",)),
        cost_estimate=cost,
    )(w_flat, b, x)
    return out.reshape(N, C_OUT, H, W)                        # metadata-only reshape


def reference(x_nchw, weight, bias):
    y = jax.lax.conv_general_dilated(
        x_nchw, weight, window_strides=(1, 1), padding=((1, 1), (1, 1)),
        dimension_numbers=("NCHW", "OIHW", "NCHW"))
    y = y + bias.reshape(1, -1, 1, 1)
    return y * jnp.tanh(jax.nn.softplus(y))


if __name__ == "__main__":
    key = jax.random.PRNGKey(0)
    k_x, k_w, k_b = jax.random.split(key, 3)

    N, H, W = 2, 16, 16
    x = jax.random.normal(k_x, (N, 1, H, W), dtype=jnp.float32)

    # kaiming_normal_(mode='fan_out', nonlinearity='relu'): std = sqrt(2 / fan_out), fan_out = 27.
    fan_out = C_OUT * KH * KW
    w_std = (2.0 / fan_out) ** 0.5
    weight = w_std * jax.random.normal(k_w, (C_OUT, 1, KH, KW), dtype=jnp.float32)
    # Conv2d default bias init: U(-1/sqrt(fan_in), 1/sqrt(fan_in)), fan_in = 1*3*3 = 9.
    bound = 1.0 / 3.0
    bias = jax.random.uniform(k_b, (C_OUT,), minval=-bound, maxval=bound, dtype=jnp.float32)

    out = conv_mish(x, weight, bias)
    out = jax.block_until_ready(out)

    ref = reference(x, weight, bias)
    assert out.shape == (N, C_OUT, H, W)
    assert jnp.allclose(out, ref, atol=1e-5, rtol=1e-4)

    print("KERNEL_OK")
</pallas_src>

<mosaic_0001>
module attributes {stable_mosaic.version = 11 : i64} {
  func.func @kernel(%arg0: i32, %arg1: memref<27xf32, #tpu.memory_space<smem>>, %arg2: memref<3xf32, #tpu.memory_space<smem>>, %arg3: memref<2x16x16xf32, #tpu.memory_space<vmem>>, %arg4: memref<6x16x16xf32, #tpu.memory_space<vmem>>) attributes {dimension_semantics = [#tpu.dimension_semantics<arbitrary>], iteration_bounds = array<i64: 1>, scalar_prefetch = 0 : i64, scratch_operands = 0 : i64, tpu.core_type = #tpu.core_type<tc>, window_params = [{transform_indices = @transform_0, window_bounds = array<i64: 27>}, {transform_indices = @transform_1, window_bounds = array<i64: 3>}, {pipeline_mode = #tpu.pipeline_mode<synchronous>, transform_indices = @transform_2, window_bounds = array<i64: 2, 16, 16>}, {pipeline_mode = #tpu.pipeline_mode<synchronous>, transform_indices = @transform_3, window_bounds = array<i64: 6, 16, 16>}]} {
    %c0 = arith.constant 0 : index
    %c0_0 = arith.constant 0 : index
    %c0_1 = arith.constant 0 : index
    %0 = vector.load %arg3[%c0, %c0_0, %c0_1] : memref<2x16x16xf32, #tpu.memory_space<vmem>>, vector<2x16x16xf32>
    %cst = arith.constant 0.000000e+00 : f32
    %1 = vector.broadcast %cst : f32 to vector<16x1xf32>
    %2 = vector.extract_strided_slice %0 {offsets = [0, 0, 0], sizes = [1, 16, 16], strides = [1, 1, 1]} : vector<2x16x16xf32> to vector<1x16x16xf32>
    %3 = vector.shape_cast %2 : vector<1x16x16xf32> to vector<16x16xf32>
    %4 = vector.extract_strided_slice %0 {offsets = [1, 0, 0], sizes = [1, 16, 16], strides = [1, 1, 1]} : vector<2x16x16xf32> to vector<1x16x16xf32>
    %5 = vector.shape_cast %4 : vector<1x16x16xf32> to vector<16x16xf32>
    %6 = tpu.concatenate %1, %3, %1, %1, %5, %1 in 1 : vector<16x1xf32>, vector<16x16xf32>, vector<16x1xf32>, vector<16x1xf32>, vector<16x16xf32>, vector<16x1xf32> -> vector<16x36xf32>
    %cst_2 = arith.constant 0.000000e+00 : f32
    %7 = vector.broadcast %cst_2 : f32 to vector<1x36xf32>
    %8 = tpu.concatenate %7, %6, %7 in 0 : vector<1x36xf32>, vector<16x36xf32>, vector<1x36xf32> -> vector<18x36xf32>
    %c0_3 = arith.constant 0 : index
    %9 = memref.load %arg2[%c0_3] : memref<3xf32, #tpu.memory_space<smem>>
    %10 = vector.broadcast %9 : f32 to vector<16x34xf32>
    %c1 = arith.constant 1 : index
    %11 = memref.load %arg2[%c1] : memref<3xf32, #tpu.memory_space<smem>>
    %12 = vector.broadcast %11 : f32 to vector<16x34xf32>
    %c2 = arith.constant 2 : index
    %13 = memref.load %arg2[%c2] : memref<3xf32, #tpu.memory_space<smem>>
    %14 = vector.broadcast %13 : f32 to vector<16x34xf32>
    %15 = vector.extract_strided_slice %8 {offsets = [0, 0], sizes = [16, 34], strides = [1, 1]} : vector<18x36xf32> to vector<16x34xf32>
    %c0_4 = arith.constant 0 : index
    %16 = memref.load %arg1[%c0_4] : memref<27xf32, #tpu.memory_space<smem>>
    %17 = vector.broadcast %16 : f32 to vector<16x34xf32>
    %18 = arith.mulf %17, %15 : vector<16x34xf32>
    %19 = arith.addf %10, %18 : vector<16x34xf32>
    %c9 = arith.constant 9 : index
    %20 = memref.load %arg1[%c9] : memref<27xf32, #tpu.memory_space<smem>>
    %21 = vector.broadcast %20 : f32 to vector<16x34xf32>
    %22 = arith.mulf %21, %15 : vector<16x34xf32>
    %23 = arith.addf %12, %22 : vector<16x34xf32>
    %c18 = arith.constant 18 : index
    %24 = memref.load %arg1[%c18] : memref<27xf32, #tpu.memory_space<smem>>
    %25 = vector.broadcast %24 : f32 to vector<16x34xf32>
    %26 = arith.mulf %25, %15 : vector<16x34xf32>
    %27 = arith.addf %14, %26 : vector<16x34xf32>
    %28 = vector.extract_strided_slice %8 {offsets = [0, 1], sizes = [16, 34], strides = [1, 1]} : vector<18x36xf32> to vector<16x34xf32>
    %c1_5 = arith.constant 1 : index
    %29 = memref.load %arg1[%c1_5] : memref<27xf32, #tpu.memory_space<smem>>
    %30 = vector.broadcast %29 : f32 to vector<16x34xf32>
    %31 = arith.mulf %30, %28 : vector<16x34xf32>
    %32 = arith.addf %19, %31 : vector<16x34xf32>
    %c10 = arith.constant 10 : index
    %33 = memref.load %arg1[%c10] : memref<27xf32, #tpu.memory_space<smem>>
    %34 = vector.broadcast %33 : f32 to vector<16x34xf32>
    %35 = arith.mulf %34, %28 : vector<16x34xf32>
    %36 = arith.addf %23, %35 : vector<16x34xf32>
    %c19 = arith.constant 19 : index
    %37 = memref.load %arg1[%c19] : memref<27xf32, #tpu.memory_space<smem>>
    %38 = vector.broadcast %37 : f32 to vector<16x34xf32>
    %39 = arith.mulf %38, %28 : vector<16x34xf32>
    %40 = arith.addf %27, %39 : vector<16x34xf32>
    %41 = vector.extract_strided_slice %8 {offsets = [0, 2], sizes = [16, 34], strides = [1, 1]} : vector<18x36xf32> to vector<16x34xf32>
    %c2_6 = arith.constant 2 : index
    %42 = memref.load %arg1[%c2_6] : memref<27xf32, #tpu.memory_space<smem>>
    %43 = vector.broadcast %42 : f32 to vector<16x34xf32>
    %44 = arith.mulf %43, %41 : vector<16x34xf32>
    %45 = arith.addf %32, %44 : vector<16x34xf32>
    %c11 = arith.constant 11 : index
    %46 = memref.load %arg1[%c11] : memref<27xf32, #tpu.memory_space<smem>>
    %47 = vector.broadcast %46 : f32 to vector<16x34xf32>
    %48 = arith.mulf %47, %41 : vector<16x34xf32>
    %49 = arith.addf %36, %48 : vector<16x34xf32>
    %c20 = arith.constant 20 : index
    %50 = memref.load %arg1[%c20] : memref<27xf32, #tpu.memory_space<smem>>
    %51 = vector.broadcast %50 : f32 to vector<16x34xf32>
    %52 = arith.mulf %51, %41 : vector<16x34xf32>
    %53 = arith.addf %40, %52 : vector<16x34xf32>
    %54 = vector.extract_strided_slice %8 {offsets = [1, 0], sizes = [16, 34], strides = [1, 1]} : vector<18x36xf32> to vector<16x34xf32>
    %c3 = arith.constant 3 : index
    %55 = memref.load %arg1[%c3] : memref<27xf32, #tpu.memory_space<smem>>
    %56 = vector.broadcast %55 : f32 to vector<16x34xf32>
    %57 = arith.mulf %56, %54 : vector<16x34xf32>
    %58 = arith.addf %45, %57 : vector<16x34xf32>
    %c12 = arith.constant 12 : index
    %59 = memref.load %arg1[%c12] : memref<27xf32, #tpu.memory_space<smem>>
    %60 = vector.broadcast %59 : f32 to vector<16x34xf32>
    %61 = arith.mulf %60, %54 : vector<16x34xf32>
    %62 = arith.addf %49, %61 : vector<16x34xf32>
    %c21 = arith.constant 21 : index
    %63 = memref.load %arg1[%c21] : memref<27xf32, #tpu.memory_space<smem>>
    %64 = vector.broadcast %63 : f32 to vector<16x34xf32>
    %65 = arith.mulf %64, %54 : vector<16x34xf32>
    %66 = arith.addf %53, %65 : vector<16x34xf32>
    %67 = vector.extract_strided_slice %8 {offsets = [1, 1], sizes = [16, 34], strides = [1, 1]} : vector<18x36xf32> to vector<16x34xf32>
    %c4 = arith.constant 4 : index
    %68 = memref.load %arg1[%c4] : memref<27xf32, #tpu.memory_space<smem>>
    %69 = vector.broadcast %68 : f32 to vector<16x34xf32>
    %70 = arith.mulf %69, %67 : vector<16x34xf32>
    %71 = arith.addf %58, %70 : vector<16x34xf32>
    %c13 = arith.constant 13 : index
    %72 = memref.load %arg1[%c13] : memref<27xf32, #tpu.memory_space<smem>>
    %73 = vector.broadcast %72 : f32 to vector<16x34xf32>
    %74 = arith.mulf %73, %67 : vector<16x34xf32>
    %75 = arith.addf %62, %74 : vector<16x34xf32>
    %c22 = arith.constant 22 : index
    %76 = memref.load %arg1[%c22] : memref<27xf32, #tpu.memory_space<smem>>
    %77 = vector.broadcast %76 : f32 to vector<16x34xf32>
    %78 = arith.mulf %77, %67 : vector<16x34xf32>
    %79 = arith.addf %66, %78 : vector<16x34xf32>
    %80 = vector.extract_strided_slice %8 {offsets = [1, 2], sizes = [16, 34], strides = [1, 1]} : vector<18x36xf32> to vector<16x34xf32>
    %c5 = arith.constant 5 : index
    %81 = memref.load %arg1[%c5] : memref<27xf32, #tpu.memory_space<smem>>
    %82 = vector.broadcast %81 : f32 to vector<16x34xf32>
    %83 = arith.mulf %82, %80 : vector<16x34xf32>
    %84 = arith.addf %71, %83 : vector<16x34xf32>
    %c14 = arith.constant 14 : index
    %85 = memref.load %arg1[%c14] : memref<27xf32, #tpu.memory_space<smem>>
    %86 = vector.broadcast %85 : f32 to vector<16x34xf32>
    %87 = arith.mulf %86, %80 : vector<16x34xf32>
    %88 = arith.addf %75, %87 : vector<16x34xf32>
    %c23 = arith.constant 23 : index
    %89 = memref.load %arg1[%c23] : memref<27xf32, #tpu.memory_space<smem>>
    %90 = vector.broadcast %89 : f32 to vector<16x34xf32>
    %91 = arith.mulf %90, %80 : vector<16x34xf32>
    %92 = arith.addf %79, %91 : vector<16x34xf32>
    %93 = vector.extract_strided_slice %8 {offsets = [2, 0], sizes = [16, 34], strides = [1, 1]} : vector<18x36xf32> to vector<16x34xf32>
    %c6 = arith.constant 6 : index
    %94 = memref.load %arg1[%c6] : memref<27xf32, #tpu.memory_space<smem>>
    %95 = vector.broadcast %94 : f32 to vector<16x34xf32>
    %96 = arith.mulf %95, %93 : vector<16x34xf32>
    %97 = arith.addf %84, %96 : vector<16x34xf32>
    %c15 = arith.constant 15 : index
    %98 = memref.load %arg1[%c15] : memref<27xf32, #tpu.memory_space<smem>>
    %99 = vector.broadcast %98 : f32 to vector<16x34xf32>
    %100 = arith.mulf %99, %93 : vector<16x34xf32>
    %101 = arith.addf %88, %100 : vector<16x34xf32>
    %c24 = arith.constant 24 : index
    %102 = memref.load %arg1[%c24] : memref<27xf32, #tpu.memory_space<smem>>
    %103 = vector.broadcast %102 : f32 to vector<16x34xf32>
    %104 = arith.mulf %103, %93 : vector<16x34xf32>
    %105 = arith.addf %92, %104 : vector<16x34xf32>
    %106 = vector.extract_strided_slice %8 {offsets = [2, 1], sizes = [16, 34], strides = [1, 1]} : vector<18x36xf32> to vector<16x34xf32>
    %c7 = arith.constant 7 : index
    %107 = memref.load %arg1[%c7] : memref<27xf32, #tpu.memory_space<smem>>
    %108 = vector.broadcast %107 : f32 to vector<16x34xf32>
    %109 = arith.mulf %108, %106 : vector<16x34xf32>
    %110 = arith.addf %97, %109 : vector<16x34xf32>
    %c16 = arith.constant 16 : index
    %111 = memref.load %arg1[%c16] : memref<27xf32, #tpu.memory_space<smem>>
    %112 = vector.broadcast %111 : f32 to vector<16x34xf32>
    %113 = arith.mulf %112, %106 : vector<16x34xf32>
    %114 = arith.addf %101, %113 : vector<16x34xf32>
    %c25 = arith.constant 25 : index
    %115 = memref.load %arg1[%c25] : memref<27xf32, #tpu.memory_space<smem>>
    %116 = vector.broadcast %115 : f32 to vector<16x34xf32>
    %117 = arith.mulf %116, %106 : vector<16x34xf32>
    %118 = arith.addf %105, %117 : vector<16x34xf32>
    %119 = vector.extract_strided_slice %8 {offsets = [2, 2], sizes = [16, 34], strides = [1, 1]} : vector<18x36xf32> to vector<16x34xf32>
    %c8 = arith.constant 8 : index
    %120 = memref.load %arg1[%c8] : memref<27xf32, #tpu.memory_space<smem>>
    %121 = vector.broadcast %120 : f32 to vector<16x34xf32>
    %122 = arith.mulf %121, %119 : vector<16x34xf32>
    %123 = arith.addf %110, %122 : vector<16x34xf32>
    %c17 = arith.constant 17 : index
    %124 = memref.load %arg1[%c17] : memref<27xf32, #tpu.memory_space<smem>>
    %125 = vector.broadcast %124 : f32 to vector<16x34xf32>
    %126 = arith.mulf %125, %119 : vector<16x34xf32>
    %127 = arith.addf %114, %126 : vector<16x34xf32>
    %c26 = arith.constant 26 : index
    %128 = memref.load %arg1[%c26] : memref<27xf32, #tpu.memory_space<smem>>
    %129 = vector.broadcast %128 : f32 to vector<16x34xf32>
    %130 = arith.mulf %129, %119 : vector<16x34xf32>
    %131 = arith.addf %118, %130 : vector<16x34xf32>
    %cst_7 = arith.constant 2.000000e+01 : f32
    %132 = vector.broadcast %cst_7 : f32 to vector<16x34xf32>
    %133 = arith.minimumf %123, %132 : vector<16x34xf32>
    %134 = math.exp %133 : vector<16x34xf32>
    %cst_8 = arith.constant 2.000000e+00 : f32
    %135 = vector.broadcast %cst_8 : f32 to vector<16x34xf32>
    %136 = arith.addf %134, %135 : vector<16x34xf32>
    %137 = arith.mulf %134, %136 : vector<16x34xf32>
    %cst_9 = arith.constant 2.000000e+00 : f32
    %138 = vector.broadcast %cst_9 : f32 to vector<16x34xf32>
    %139 = arith.addf %137, %138 : vector<16x34xf32>
    %140 = tpu.reciprocal %139 {approx = true} : vector<16x34xf32> -> vector<16x34xf32>
    %141 = arith.mulf %139, %140 : vector<16x34xf32>
    %cst_10 = arith.constant 2.000000e+00 : f32
    %142 = vector.broadcast %cst_10 : f32 to vector<16x34xf32>
    %143 = arith.subf %142, %141 : vector<16x34xf32>
    %144 = arith.mulf %140, %143 : vector<16x34xf32>
    %cst_11 = arith.constant 2.000000e+01 : f32
    %145 = vector.broadcast %cst_11 : f32 to vector<16x34xf32>
    %146 = arith.cmpf ogt, %123, %145 : vector<16x34xf32>
    %147 = arith.mulf %123, %137 : vector<16x34xf32>
    %148 = arith.mulf %147, %144 : vector<16x34xf32>
    %149 = arith.select %146, %123, %148 : vector<16x34xi1>, vector<16x34xf32>
    %150 = vector.extract_strided_slice %149 {offsets = [0, 0], sizes = [16, 16], strides = [1, 1]} : vector<16x34xf32> to vector<16x16xf32>
    %c0_12 = arith.constant 0 : index
    %c0_13 = arith.constant 0 : index
    %c0_14 = arith.constant 0 : index
    %151 = vector.load %arg4[%c0_12, %c0_13, %c0_14] : memref<6x16x16xf32, #tpu.memory_space<vmem>>, vector<1x16x16xf32>
    %152 = vector.shape_cast %151 : vector<1x16x16xf32> to vector<16x16xf32>
    %153 = vector.shape_cast %150 : vector<16x16xf32> to vector<1x16x16xf32>
    tpu.vector_store %arg4[%c0_12, %c0_13, %c0_14], %153 {strides = array<i32>} : memref<6x16x16xf32, #tpu.memory_space<vmem>>, vector<1x16x16xf32>,
    %154 = vector.extract_strided_slice %149 {offsets = [0, 18], sizes = [16, 16], strides = [1, 1]} : vector<16x34xf32> to vector<16x16xf32>
    %c3_15 = arith.constant 3 : index
    %c0_16 = arith.constant 0 : index
    %c0_17 = arith.constant 0 : index
    %155 = vector.load %arg4[%c3_15, %c0_16, %c0_17] : memref<6x16x16xf32, #tpu.memory_space<vmem>>, vector<1x16x16xf32>
    %156 = vector.shape_cast %155 : vector<1x16x16xf32> to vector<16x16xf32>
    %157 = vector.shape_cast %154 : vector<16x16xf32> to vector<1x16x16xf32>
    tpu.vector_store %arg4[%c3_15, %c0_16, %c0_17], %157 {strides = array<i32>} : memref<6x16x16xf32, #tpu.memory_space<vmem>>, vector<1x16x16xf32>,
    %cst_18 = arith.constant 2.000000e+01 : f32
    %158 = vector.broadcast %cst_18 : f32 to vector<16x34xf32>
    %159 = arith.minimumf %127, %158 : vector<16x34xf32>
    %160 = math.exp %159 : vector<16x34xf32>
    %cst_19 = arith.constant 2.000000e+00 : f32
    %161 = vector.broadcast %cst_19 : f32 to vector<16x34xf32>
    %162 = arith.addf %160, %161 : vector<16x34xf32>
    %163 = arith.mulf %160, %162 : vector<16x34xf32>
    %cst_20 = arith.constant 2.000000e+00 : f32
    %164 = vector.broadcast %cst_20 : f32 to vector<16x34xf32>
    %165 = arith.addf %163, %164 : vector<16x34xf32>
    %166 = tpu.reciprocal %165 {approx = true} : vector<16x34xf32> -> vector<16x34xf32>
    %167 = arith.mulf %165, %166 : vector<16x34xf32>
    %cst_21 = arith.constant 2.000000e+00 : f32
    %168 = vector.broadcast %cst_21 : f32 to vector<16x34xf32>
    %169 = arith.subf %168, %167 : vector<16x34xf32>
    %170 = arith.mulf %166, %169 : vector<16x34xf32>
    %cst_22 = arith.constant 2.000000e+01 : f32
    %171 = vector.broadcast %cst_22 : f32 to vector<16x34xf32>
    %172 = arith.cmpf ogt, %127, %171 : vector<16x34xf32>
    %173 = arith.mulf %127, %163 : vector<16x34xf32>
    %174 = arith.mulf %173, %170 : vector<16x34xf32>
    %175 = arith.select %172, %127, %174 : vector<16x34xi1>, vector<16x34xf32>
    %176 = vector.extract_strided_slice %175 {offsets = [0, 0], sizes = [16, 16], strides = [1, 1]} : vector<16x34xf32> to vector<16x16xf32>
    %c1_23 = arith.constant 1 : index
    %c0_24 = arith.constant 0 : index
    %c0_25 = arith.constant 0 : index
    %177 = vector.load %arg4[%c1_23, %c0_24, %c0_25] : memref<6x16x16xf32, #tpu.memory_space<vmem>>, vector<1x16x16xf32>
    %178 = vector.shape_cast %177 : vector<1x16x16xf32> to vector<16x16xf32>
    %179 = vector.shape_cast %176 : vector<16x16xf32> to vector<1x16x16xf32>
    tpu.vector_store %arg4[%c1_23, %c0_24, %c0_25], %179 {strides = array<i32>} : memref<6x16x16xf32, #tpu.memory_space<vmem>>, vector<1x16x16xf32>,
    %180 = vector.extract_strided_slice %175 {offsets = [0, 18], sizes = [16, 16], strides = [1, 1]} : vector<16x34xf32> to vector<16x16xf32>
    %c4_26 = arith.constant 4 : index
    %c0_27 = arith.constant 0 : index
    %c0_28 = arith.constant 0 : index
    %181 = vector.load %arg4[%c4_26, %c0_27, %c0_28] : memref<6x16x16xf32, #tpu.memory_space<vmem>>, vector<1x16x16xf32>
    %182 = vector.shape_cast %181 : vector<1x16x16xf32> to vector<16x16xf32>
    %183 = vector.shape_cast %180 : vector<16x16xf32> to vector<1x16x16xf32>
    tpu.vector_store %arg4[%c4_26, %c0_27, %c0_28], %183 {strides = array<i32>} : memref<6x16x16xf32, #tpu.memory_space<vmem>>, vector<1x16x16xf32>,
    %cst_29 = arith.constant 2.000000e+01 : f32
    %184 = vector.broadcast %cst_29 : f32 to vector<16x34xf32>
    %185 = arith.minimumf %131, %184 : vector<16x34xf32>
    %186 = math.exp %185 : vector<16x34xf32>
    %cst_30 = arith.constant 2.000000e+00 : f32
    %187 = vector.broadcast %cst_30 : f32 to vector<16x34xf32>
    %188 = arith.addf %186, %187 : vector<16x34xf32>
    %189 = arith.mulf %186, %188 : vector<16x34xf32>
    %cst_31 = arith.constant 2.000000e+00 : f32
    %190 = vector.broadcast %cst_31 : f32 to vector<16x34xf32>
    %191 = arith.addf %189, %190 : vector<16x34xf32>
    %192 = tpu.reciprocal %191 {approx = true} : vector<16x34xf32> -> vector<16x34xf32>
    %193 = arith.mulf %191, %192 : vector<16x34xf32>
    %cst_32 = arith.constant 2.000000e+00 : f32
    %194 = vector.broadcast %cst_32 : f32 to vector<16x34xf32>
    %195 = arith.subf %194, %193 : vector<16x34xf32>
    %196 = arith.mulf %192, %195 : vector<16x34xf32>
    %cst_33 = arith.constant 2.000000e+01 : f32
    %197 = vector.broadcast %cst_33 : f32 to vector<16x34xf32>
    %198 = arith.cmpf ogt, %131, %197 : vector<16x34xf32>
    %199 = arith.mulf %131, %189 : vector<16x34xf32>
    %200 = arith.mulf %199, %196 : vector<16x34xf32>
    %201 = arith.select %198, %131, %200 : vector<16x34xi1>, vector<16x34xf32>
    %202 = vector.extract_strided_slice %201 {offsets = [0, 0], sizes = [16, 16], strides = [1, 1]} : vector<16x34xf32> to vector<16x16xf32>
    %c2_34 = arith.constant 2 : index
    %c0_35 = arith.constant 0 : index
    %c0_36 = arith.constant 0 : index
    %203 = vector.load %arg4[%c2_34, %c0_35, %c0_36] : memref<6x16x16xf32, #tpu.memory_space<vmem>>, vector<1x16x16xf32>
    %204 = vector.shape_cast %203 : vector<1x16x16xf32> to vector<16x16xf32>
    %205 = vector.shape_cast %202 : vector<16x16xf32> to vector<1x16x16xf32>
    tpu.vector_store %arg4[%c2_34, %c0_35, %c0_36], %205 {strides = array<i32>} : memref<6x16x16xf32, #tpu.memory_space<vmem>>, vector<1x16x16xf32>,
    %206 = vector.extract_strided_slice %201 {offsets = [0, 18], sizes = [16, 16], strides = [1, 1]} : vector<16x34xf32> to vector<16x16xf32>
    %c5_37 = arith.constant 5 : index
    %c0_38 = arith.constant 0 : index
    %c0_39 = arith.constant 0 : index
    %207 = vector.load %arg4[%c5_37, %c0_38, %c0_39] : memref<6x16x16xf32, #tpu.memory_space<vmem>>, vector<1x16x16xf32>
    %208 = vector.shape_cast %207 : vector<1x16x16xf32> to vector<16x16xf32>
    %209 = vector.shape_cast %206 : vector<16x16xf32> to vector<1x16x16xf32>
    tpu.vector_store %arg4[%c5_37, %c0_38, %c0_39], %209 {strides = array<i32>} : memref<6x16x16xf32, #tpu.memory_space<vmem>>, vector<1x16x16xf32>,
    return
  }
  func.func @transform_0(%arg0: i32) -> i32 {
    %c0_i32 = arith.constant 0 : i32
    %c0_i32_0 = arith.constant 0 : i32
    return %c0_i32 : i32
  }
  func.func @transform_1(%arg0: i32) -> i32 {
    %c0_i32 = arith.constant 0 : i32
    %c0_i32_0 = arith.constant 0 : i32
    return %c0_i32 : i32
  }
  func.func @transform_2(%arg0: i32) -> (i32, i32, i32) {
    %c0_i32 = arith.constant 0 : i32
    %c0_i32_0 = arith.constant 0 : i32
    %c0_i32_1 = arith.constant 0 : i32
    %c0_i32_2 = arith.constant 0 : i32
    return %c0_i32, %c0_i32_0, %c0_i32_1 : i32, i32, i32
  }
  func.func @transform_3(%arg0: i32) -> (i32, i32, i32) {
    %c0_i32 = arith.constant 0 : i32
    %c0_i32_0 = arith.constant 0 : i32
    %c0_i32_1 = arith.constant 0 : i32
    %c0_i32_2 = arith.constant 0 : i32
    return %c0_i32, %c0_i32_0, %c0_i32_1 : i32, i32, i32
  }
}

</mosaic_0001>

<bundles_post_ra>
// kernel: tpu_custom_call.1
= control target key start
LH: loop header
LB: loop body
LE: loop exit
PB: predicated region body
PF: predicated region fallthrough
CT: control target
= control target key end

     0   :  { %8 = vsyncpa [#allocation5], 0  ;;  %s1265_s0 = inlined_call_operand.hbm [shape: f32[27], index: 0, kind: input, shape index: {}]   ;;  %s1266_s1 = inlined_call_operand.vmem [shape: f32[3], index: 1, kind: input, shape index: {}]   ;;  %s1267_s2 = inlined_call_operand.hbm [shape: f32[2,16,16], index: 2, kind: input, shape index: {}]   ;;  %s1268_s3 = inlined_call_operand.hbm [shape: f32[6,16,16], index: 3, kind: output, shape index: {}]  }
   0x1   :  { %9 = vsyncpa [#allocation6], 0 }
   0x2   :  { %10 = vsyncpa [#allocation3], 0 }
   0x3   :  { %11 = vsyncpa [#allocation4], 0  ;;  %s26_s14 = sshll.u32 %s1266_s1, 4  ;;  %s838_s15 = smov [#allocation2]   ;;  %s27_s14 = int_to_ptr.vmem [resolvable:$true] %s26_s14 }
   0x4   :  { %19 = dma.hbm_to_smem %s1265_s0, 16, %s838_s15, [#allocation5]  }
   0x5   :  { %s778_s18 = scalar_lea.vmem %s27_s14, 16  ;;  %p783_p1 = scmp.lt.s32.totalorder %s27_s14, %s27_s14 }
   0x6   :  { %p779_p0 = scmp.ne.s32.totalorder %s27_s14, %s778_s18  ;;  %p784_p2 = scmp.lt.s32.totalorder %s778_s18, %s778_s18 }
   0x8   :  { %p785_p3 = por %p784_p2, %p783_p1 }
   0xa   :  { %p786_p4 = pnand %p785_p3, %p779_p0 }
   0xc   :  { %789 = shalt.err (!%p786_p4)
}
   0xd   :  { %s839_s19 = smov [#allocation7]   ;;  %s840_s20 = smov [#allocation8]  }
   0xe   :  { %29 = dma.vmem_to_smem %s27_s14, 16, %s839_s19, [#allocation6]  }
   0xf   :  { %s35_s21 = sshll.u32 %s840_s20, 4  ;;  %s36_s21 = int_to_ptr.vmem [resolvable:$true] %s35_s21 }
  0x10   :  { %s798_s22 = scalar_lea.vmem %s36_s21, 512  ;;  %p803_p6 = scmp.lt.s32.totalorder %s36_s21, %s36_s21 }
  0x11   :  { %p799_p5 = scmp.ne.s32.totalorder %s36_s21, %s798_s22  ;;  %p804_p7 = scmp.lt.s32.totalorder %s798_s22, %s798_s22 }
  0x13   :  { %p805_p8 = por %p804_p7, %p803_p6 }
  0x15   :  { %p806_p9 = pnand %p805_p8, %p799_p5 }
  0x17   :  { %809 = shalt.err (!%p806_p9)
}
  0x18   :  { %s841_s0 = smov 128   ;;  %s842_s1 = smov 8  }
  0x19   :  { %41 = dma.hbm_to_vmem [thread:$0]  %s1267_s2, 512, %s36_s21, [#allocation3], %s841_s0, %s841_s0, %s842_s1  }
  0x1a   :  { %830 = dma.done.wait [#allocation5], 16  }
  0x1b   :  { %831 = vsyncadd [#allocation5], 4294967280 }
  0x1c   :  { %832 = dma.done.wait [#allocation6], 16  }
  0x1d   :  { %833 = vsyncadd [#allocation6], 4294967280 }
  0x1e   :  { %834 = dma.done.wait [#allocation3], 512  }
  0x1f   :  { %835 = vsyncadd [#allocation3], 4294966784 }
  0x20   :  { %51 = sfence }
  0x21   :  { %v52_v0 = vld [vmem:[#allocation8] sm:$0xff]  ;;  %v54_v1 = vld [vmem:[#allocation8 + $0x10] sm:$0xff]  ;;  %s843_s25 = smov 1   ;;  %s844_s26 = smov 19   ;;  %v53_v2 = vld [vmem:[#allocation8 + $0x8] sm:$0xff]  ;;  %vm72_vm0 = vcmask 7168  }
  0x22   :  { %58 = vrot.lane.b32.xlu0 %v52_v0, %s843_s25  ;;  %66 = vrot.lane.b32.xlu1 %v54_v1, %s844_s26  ;;  %v55_v3 = vld [vmem:[#allocation8 + $0x18] sm:$0xff]  ;;  %s881_s27 = sld [smem:[#allocation2 + $0x1]]  ;;  %vm75_vm1 = vcmask 138240   ;;  %vm78_vm2 = vcmask 146432   ;;  %vm81_vm3 = vcmask 154624   ;;  %vm84_vm4 = vcmask 285696  }
  0x23   :  { %s885_s2 = sld [smem:[#allocation2 + $0xa]]  ;;  %vm89_vm5 = vcmask 1040384   ;;  %s845_s6 = smov 127   ;;  %vm214_vm6 = vcmask 1046528   ;;  %vm392_vm7 = vcmask 1045504   ;;  %vm590_vm8 = vcmask 130048  }
  0x24   :  { %s893_s28 = sld [smem:[#allocation2 + $0x13]]  ;;  %s846_s17 = smov 126  }
  0x25   :  { %s896_s29 = sld [smem:[#allocation2 + $0x2]] }
  0x26   :  { %60 = vrot.lane.b32.xlu0 %v53_v2, %s843_s25  ;;  %68 = vrot.lane.b32.xlu1 %v55_v3, %s844_s26  ;;  %s902_s30 = sld [smem:[#allocation2 + $0xb]] }
  0x27   :  { %s906_s4 = sld [smem:[#allocation2 + $0x14]] }
  0x28   :  { %v123_v16 = vstv %s881_s27  ;;  %s909_s5 = sld [smem:[#allocation2 + $0x4]] }
  0x29   :  { %v137_v23 = vstv %s885_s2  ;;  %s912_s7 = sld [smem:[#allocation2 + $0xd]] }
  0x2a   :  { %s722_s8 = sld [smem:[#allocation2 + $0x16]]  ;;  %v151_v27 = vstv %s893_s28 }
  0x2b   :  { %s723_s9 = sld [smem:[#allocation2 + $0x5]]  ;;  %v165_v30 = vstv %s896_s29 }
  0x2c   :  { %s724_s10 = sld [smem:[#allocation2 + $0xe]]  ;;  %v179_v33 = vstv %s902_s30  ;;  %s847_s30 = smov 110  }
  0x2d   :  { %s725_s11 = sld [smem:[#allocation2 + $0x17]]  ;;  %v193_v34 = vstv %s906_s4  ;;  %s848_s4 = smov [#allocation9]  }
  0x2e   :  { %s729_s12 = sld [smem:[#allocation2 + $0x7]]  ;;  %v259_v35 = vstv %s909_s5  ;;  %s693_s5 = sshll.u32 %s848_s4, 4  ;;  %s694_s5 = int_to_ptr.vmem [resolvable:$true] %s693_s5 }
  0x2f   :  { %s717_s13 = sld [smem:[#allocation2 + $0x3]]  ;;  %v280_v36 = vstv %s912_s7  ;;  %p815_p11 = scmp.lt.s32.totalorder %s694_s5, %s694_s5 }
  0x30   :  { %s718_s14 = sld [smem:[#allocation2 + $0xc]]  ;;  %v301_v37 = vstv %s722_s8 }
  0x31   :  { %s719_s15 = sld [smem:[#allocation2 + $0x15]]  ;;  %v322_v38 = vstv %s723_s9 }
  0x32   :  { %s726_s16 = sld [smem:[#allocation2 + $0x6]]  ;;  %v343_v42 = vstv %s724_s10 }
  0x33   :  { %s933_s18 = sld [smem:[#allocation2 + $0xf]]  ;;  %v943_v44 = vstv %s725_s11 }
  0x34   :  { %v945_v45 = vstv %s729_s12  ;;  %s955_s19 = sld [smem:[#allocation2 + $0x18]] }
  0x35   :  { %v947_v46 = vstv %s717_s13  ;;  %s1054_s20 = sld [smem:[#allocation2 + $0x10]] }
  0x36   :  { %v951_v47 = vstv %s718_s14  ;;  %s1086_s21 = sld [smem:[#allocation2 + $0x19]] }
  0x37   :  { %v953_v48 = vstv %s719_s15  ;;  %s732_s22 = sld [smem:[#allocation2 + $0x8]] }
  0x38   :  { %v960_v52 = vstv %s726_s16  ;;  %s733_s23 = sld [smem:[#allocation2 + $0x11]] }
  0x39   :  { %v977_v0 = vstv %s933_s18  ;;  %s734_s24 = sld [smem:[#allocation2 + $0x1a]] }
  0x3a   :  { %s104_s25 = sld [smem:[#allocation2]] }
  0x3b   :  { %s98_s26 = sld [smem:[#allocation7]] }
  0x3c   :  { %s709_s27 = sld [smem:[#allocation2 + $0x9]] }
  0x3d   :  { %s1181_s2 = sld [smem:[#allocation7 + $0x1]] }
  0x3e   :  { %s710_s28 = sld [smem:[#allocation2 + $0x12]] }
  0x3f   :  { %s1184_s29 = sld [smem:[#allocation7 + $0x2]] }
  0x94   :  { %v59_v4 = vpop.permute.xlu0 %58  ;;  %v67_v5 = vpop.permute.xlu1 %66 }
  0x95   :  { %v73_v6 = vsel %vm72_vm0, 0.0, %v59_v4 }
  0x96   :  { %v76_v7 = vsel %vm75_vm1, %v73_v6, 0.0 }
  0x97   :  { %v79_v8 = vsel %vm78_vm2, %v76_v7, 0.0 }
  0x98   :  { %v82_v9 = vsel %vm81_vm3, %v79_v8, %v67_v5  ;;  %v61_v10 = vpop.permute.xlu0 %60  ;;  %v69_v13 = vpop.permute.xlu1 %68 }
  0x99   :  { %v85_v11 = vsel %vm84_vm4, %v82_v9, 0.0  ;;  %v74_v12 = vsel %vm72_vm0, 0.0, %v61_v10 }
  0x9a   :  { %v90_v14 = vrot.slane %v85_v11, 7  ;;  %v77_v15 = vsel %vm75_vm1, %v74_v12, 0.0 }
  0x9b   :  { %v80_v17 = vsel %vm78_vm2, %v77_v15, 0.0 }
  0x9c   :  { %v899_v18 = vsel %vm89_vm5, 0.0, %v90_v14  ;;  %v83_v19 = vsel %vm81_vm3, %v80_v17, %v69_v13 }
  0x9d   :  { %v86_v20 = vsel %vm84_vm4, %v83_v19, 0.0  ;;  %v124_v21 = vmul.f32 %v123_v16, %v899_v18  ;;  %v138_v25 = vmul.f32 %v137_v23, %v899_v18  ;;  %v152_v28 = vmul.f32 %v151_v27, %v899_v18 }
  0x9e   :  { %v91_v22 = vrot.slane %v86_v20, 7  ;;  %v166_v31 = vmul.f32 %v165_v30, %v899_v18  ;;  %v180_v40 = vmul.f32 %v179_v33, %v899_v18  ;;  %v260_v49 = vmul.f32 %v259_v35, %v899_v18 }
  0x9f   :  { %128 = vrot.lane.b32.xlu0 %v124_v21, %s845_s6  ;;  %v194_v53 = vmul.f32 %v193_v34, %v899_v18  ;;  %v281_v58 = vmul.f32 %v280_v36, %v899_v18  ;;  %v302_v61 = vmul.f32 %v301_v37, %v899_v18  ;;  %v323_v62 = vmul.f32 %v322_v38, %v899_v18 }
  0xa0   :  { %v915_v24 = vsel %vm89_vm5, %v90_v14, %v91_v22  ;;  %v938_v39 = vsel %vm89_vm5, %v91_v22, 0.0  ;;  %v344_v63 = vmul.f32 %v343_v42, %v899_v18  ;;  %v266_v1 = vrot.slane %v260_v49, 1 }
  0xa1   :  { %v125_v26 = vmul.f32 %v123_v16, %v915_v24  ;;  %v139_v29 = vmul.f32 %v137_v23, %v915_v24  ;;  %v153_v32 = vmul.f32 %v151_v27, %v915_v24  ;;  %v167_v41 = vmul.f32 %v165_v30, %v915_v24 }
  0xa2   :  { %v261_v43 = vmul.f32 %v259_v35, %v915_v24  ;;  %v282_v50 = vmul.f32 %v280_v36, %v915_v24  ;;  %v262_v51 = vmul.f32 %v259_v35, %v938_v39  ;;  %v181_v54 = vmul.f32 %v179_v33, %v915_v24 }
  0xa3   :  { %142 = vrot.lane.b32.xlu0 %v138_v25, %s845_s6  ;;  %130 = vrot.lane.b32.xlu1 %v125_v26, %s845_s6  ;;  %v303_v55 = vmul.f32 %v301_v37, %v915_v24  ;;  %v283_v56 = vmul.f32 %v280_v36, %v938_v39  ;;  %v968_v59 = vmul.f32 %v322_v38, %v915_v24  ;;  %v287_v10 = vrot.slane %v281_v58, 1 }
  0xa4   :  { %v267_v57 = vrot.slane %v261_v43, 1  ;;  %v304_v60 = vmul.f32 %v301_v37, %v938_v39  ;;  %v288_v2 = vrot.slane %v282_v50, 1  ;;  %v269_v3 = vrot.slane %v262_v51, 1 }
  0xa5   :  { %v981_v4 = vmul.f32 %v943_v44, %v899_v18  ;;  %v195_v5 = vmul.f32 %v193_v34, %v915_v24  ;;  %v309_v6 = vrot.slane %v303_v55, 1  ;;  %v290_v7 = vrot.slane %v283_v56, 1 }
  0xa6   :  { %v985_v8 = vmul.f32 %v343_v42, %v915_v24  ;;  %v268_v9 = vsel %vm214_vm6, %v266_v1, %v267_v57  ;;  %v330_v11 = vrot.slane %v968_v59, 1  ;;  %v311_v12 = vrot.slane %v304_v60, 1 }
  0xa7   :  { %156 = vrot.lane.b32.xlu0 %v152_v28, %s845_s6  ;;  %144 = vrot.lane.b32.xlu1 %v139_v29, %s845_s6  ;;  %v308_v13 = vrot.slane %v302_v61, 1  ;;  %v992_v14 = vmul.f32 %v322_v38, %v938_v39  ;;  %v996_v15 = vmul.f32 %v943_v44, %v915_v24  ;;  %v999_v16 = vstv %s955_s19 }
  0xa8   :  { %v289_v17 = vsel %vm214_vm6, %v287_v10, %v288_v2  ;;  %v270_v19 = vsel %vm214_vm6, %v267_v57, %v269_v3  ;;  %v329_v20 = vrot.slane %v323_v62, 1  ;;  %v1004_v21 = vmul.f32 %v343_v42, %v938_v39 }
  0xa9   :  { %v310_v22 = vsel %vm214_vm6, %v308_v13, %v309_v6  ;;  %v291_v23 = vsel %vm214_vm6, %v288_v2, %v290_v7  ;;  %v350_v25 = vrot.slane %v344_v63, 1  ;;  %v351_v26 = vrot.slane %v985_v8, 1 }
  0xaa   :  { %v331_v27 = vsel %vm214_vm6, %v329_v20, %v330_v11  ;;  %v312_v28 = vsel %vm214_vm6, %v309_v6, %v311_v12  ;;  %v371_v29 = vrot.slane %v981_v4, 1  ;;  %v1016_v30 = vmul.f32 %v945_v45, %v899_v18 }
  0xab   :  { %170 = vrot.lane.b32.xlu0 %v166_v31, %s846_s17  ;;  %158 = vrot.lane.b32.xlu1 %v153_v32, %s845_s6  ;;  %v332_v31 = vrot.slane %v992_v14, 1  ;;  %v372_v32 = vrot.slane %v996_v15, 1  ;;  %v1024_v33 = vmul.f32 %v945_v45, %v915_v24  ;;  %v208_v34 = vmul.f32 %v947_v46, %v899_v18 }
  0xac   :  { %v353_v35 = vrot.slane %v1004_v21, 1  ;;  %v1031_v36 = vmul.f32 %v943_v44, %v938_v39  ;;  %v209_v37 = vmul.f32 %v947_v46, %v915_v24  ;;  %v210_v38 = vmul.f32 %v947_v46, %v938_v39 }
  0xad   :  { %v226_v42 = vmul.f32 %v951_v47, %v899_v18  ;;  %v227_v43 = vmul.f32 %v951_v47, %v915_v24  ;;  %v228_v50 = vmul.f32 %v951_v47, %v938_v39  ;;  %v243_v51 = vmul.f32 %v953_v48, %v899_v18 }
  0xae   :  { %v216_v49 = vrot.slane %v209_v37, 1  ;;  %v218_v44 = vrot.slane %v210_v38, 1  ;;  %v245_v55 = vmul.f32 %v953_v48, %v938_v39  ;;  %v386_v63 = vmul.f32 %v960_v52, %v899_v18 }
  0xaf   :  { %184 = vrot.lane.b32.xlu0 %v180_v40, %s846_s17  ;;  %172 = vrot.lane.b32.xlu1 %v167_v41, %s846_s17  ;;  %v352_v40 = vsel %vm214_vm6, %v350_v25, %v351_v26  ;;  %v215_v41 = vrot.slane %v208_v34, 1  ;;  %v232_v46 = vrot.slane %v226_v42, 1  ;;  %v235_v57 = vrot.slane %v228_v50, 1 }
  0xb0   :  { %v1060_v47 = vsel %vm214_vm6, %v216_v49, %v218_v44  ;;  %v249_v58 = vrot.slane %v243_v51, 1  ;;  %v252_v62 = vrot.slane %v245_v55, 1  ;;  %v387_v1 = vmul.f32 %v960_v52, %v915_v24 }
  0xb1   :  { %v1057_v56 = vsel %vm214_vm6, %v215_v41, %v216_v49  ;;  %v388_v2 = vmul.f32 %v960_v52, %v938_v39  ;;  %v404_v3 = vmul.f32 %v977_v0, %v899_v18  ;;  %v393_v7 = vrot.slane %v386_v63, 2 }
  0xb2   :  { %v394_v52 = vrot.slane %v387_v1, 2  ;;  %v406_v13 = vmul.f32 %v977_v0, %v938_v39  ;;  %v423_v20 = vmul.f32 %v999_v16, %v938_v39  ;;  %v458_v59 = vstv %s1054_s20 }
  0xb3   :  { %198 = vrot.lane.b32.xlu0 %v194_v53, %s846_s17  ;;  %186 = vrot.lane.b32.xlu1 %v181_v54, %s846_s17  ;;  %v233_v53 = vrot.slane %v227_v43, 1  ;;  %v244_v54 = vmul.f32 %v953_v48, %v915_v24  ;;  %v396_v10 = vrot.slane %v388_v2, 2  ;;  %v410_v12 = vrot.slane %v404_v3, 2 }
  0xb4   :  { %v430_v34 = vrot.slane %v423_v20, 2  ;;  %v445_v37 = vrot.slane %v1024_v33, 2  ;;  %v354_v41 = vsel %vm214_vm6, %v351_v26, %v353_v35  ;;  %v374_v42 = vrot.slane %v1031_v36, 1 }
  0xb5   :  { %v1063_v60 = vsel %vm214_vm6, %v232_v46, %v233_v53  ;;  %v250_v61 = vrot.slane %v244_v54, 1  ;;  %v1068_v48 = vsel %vm214_vm6, %v233_v53, %v235_v57  ;;  %v1103_v25 = vsel %vm392_vm7, %v394_v52, %v396_v10 }
  0xb6   :  { %v460_v4 = vmul.f32 %v458_v59, %v915_v24  ;;  %v444_v33 = vrot.slane %v1016_v30, 2  ;;  %v459_v43 = vmul.f32 %v458_v59, %v899_v18  ;;  %v479_v21 = vstv %s1086_s21 }
  0xb7   :  { %271 = vrot.lane.b32.xlu0 %v268_v9, %s845_s6  ;;  %200 = vrot.lane.b32.xlu1 %v195_v5, %s846_s17  ;;  %v1079_v5 = vsel %vm214_vm6, %v249_v58, %v250_v61  ;;  %v1082_v6 = vsel %vm214_vm6, %v250_v61, %v252_v62  ;;  %v405_v9 = vmul.f32 %v977_v0, %v915_v24  ;;  %v413_v0 = vrot.slane %v406_v13, 2 }
  0xb8   :  { %v446_v8 = vsel %vm392_vm7, %v444_v33, %v445_v37  ;;  %v481_v26 = vmul.f32 %v479_v21, %v915_v24  ;;  %v375_v35 = vsel %vm214_vm6, %v372_v32, %v374_v42  ;;  %v466_v36 = vrot.slane %v460_v4, 2 }
  0xb9   :  { %v411_v14 = vrot.slane %v405_v9, 2  ;;  %v461_v49 = vmul.f32 %v458_v59, %v938_v39  ;;  %v480_v30 = vmul.f32 %v479_v21, %v899_v18  ;;  %v465_v44 = vrot.slane %v459_v43, 2 }
  0xba   :  { %v500_v50 = vstv %s732_s22  ;;  %v487_v51 = vrot.slane %v481_v26, 2  ;;  %v482_v54 = vmul.f32 %v479_v21, %v938_v39  ;;  %v521_v62 = vstv %s733_s23 }
  0xbb   :  { %292 = vrot.lane.b32.xlu0 %v289_v17, %s845_s6  ;;  %273 = vrot.lane.b32.xlu1 %v270_v19, %s845_s6  ;;  %v421_v17 = vmul.f32 %v999_v16, %v899_v18  ;;  %v422_v19 = vmul.f32 %v999_v16, %v915_v24  ;;  %v502_v46 = vmul.f32 %v500_v50, %v915_v24  ;;  %v468_v53 = vrot.slane %v461_v49, 2 }
  0xbc   :  { %v467_v15 = vsel %vm392_vm7, %v465_v44, %v466_v36  ;;  %v486_v55 = vrot.slane %v480_v30, 2  ;;  %v501_v57 = vmul.f32 %v500_v50, %v899_v18  ;;  %v489_v1 = vrot.slane %v482_v54, 2 }
  0xbd   :  { %v428_v16 = vrot.slane %v422_v19, 2  ;;  %v508_v61 = vrot.slane %v502_v46, 2  ;;  %v469_v63 = vsel %vm392_vm7, %v466_v36, %v468_v53  ;;  %v523_v2 = vmul.f32 %v521_v62, %v915_v24 }
  0xbe   :  { %v488_v58 = vsel %vm392_vm7, %v486_v55, %v487_v51  ;;  %v503_v3 = vmul.f32 %v500_v50, %v938_v39  ;;  %v522_v9 = vmul.f32 %v521_v62, %v899_v18  ;;  %v490_v13 = vsel %vm392_vm7, %v487_v51, %v489_v1 }
  0xbf   :  { %313 = vrot.lane.b32.xlu0 %v310_v22, %s845_s6  ;;  %294 = vrot.lane.b32.xlu1 %v291_v23, %s845_s6  ;;  %v333_v22 = vsel %vm214_vm6, %v330_v11, %v332_v31  ;;  %v1100_v23 = vsel %vm392_vm7, %v393_v7, %v394_v52  ;;  %v1112_v11 = vsel %vm392_vm7, %v411_v14, %v413_v0  ;;  %v507_v7 = vrot.slane %v501_v57, 2 }
  0xc0   :  { %v373_v31 = vsel %vm214_vm6, %v371_v29, %v372_v32  ;;  %v440_v29 = vmul.f32 %v945_v45, %v938_v39  ;;  %v542_v52 = vstv %s734_s24  ;;  %v524_v19 = vmul.f32 %v521_v62, %v938_v39 }
  0xc1   :  { %v509_v10 = vsel %vm392_vm7, %v507_v7, %v508_v61  ;;  %v528_v20 = vrot.slane %v522_v9, 2  ;;  %v545_v59 = vmul.f32 %v542_v52, %v938_v39  ;;  %v111_v26 = vstv %s709_s27 }
  0xc2   :  { %v447_v45 = vrot.slane %v440_v29, 2  ;;  %v105_v29 = vstv %s104_s25  ;;  %v112_v30 = vmul.f32 %v111_v26, %v899_v18  ;;  %v101_v44 = vstv %s1181_s2 }
  0xc3   :  { %334 = vrot.lane.b32.xlu0 %v331_v27, %s846_s17  ;;  %315 = vrot.lane.b32.xlu1 %v312_v28, %s845_s6  ;;  %v1108_v27 = vsel %vm392_vm7, %v410_v12, %v411_v14  ;;  %v427_v28 = vrot.slane %v421_v17, 2  ;;  %v544_v12 = vmul.f32 %v542_v52, %v915_v24  ;;  %v529_v14 = vrot.slane %v523_v2, 2 }
  0xc4   :  { %v448_v32 = vsel %vm392_vm7, %v445_v37, %v447_v45  ;;  %v510_v17 = vrot.slane %v503_v3, 2  ;;  %v552_v42 = vrot.slane %v545_v59, 2  ;;  %v106_v21 = vmul.f32 %v105_v29, %v899_v18 }
  0xc5   :  { %v1121_v38 = vsel %vm392_vm7, %v427_v28, %v428_v16  ;;  %v550_v0 = vrot.slane %v544_v12, 2  ;;  %v530_v28 = vsel %vm392_vm7, %v528_v20, %v529_v14  ;;  %v117_v50 = vstv %s710_s28 }
  0xc6   :  { %v114_v53 = vadd.f32 %v112_v30, %v101_v44  ;;  %v113_v54 = vmul.f32 %v111_v26, %v915_v24  ;;  %v118_v55 = vmul.f32 %v117_v50, %v899_v18  ;;  %v119_v1 = vmul.f32 %v117_v50, %v915_v24 }
  0xc7   :  { %355 = vrot.lane.b32.xlu0 %v352_v40, %s846_s17  ;;  %336 = vrot.lane.b32.xlu1 %v333_v22, %s846_s17  ;;  %v1124_v40 = vsel %vm392_vm7, %v428_v16, %v430_v34  ;;  %v543_v22 = vmul.f32 %v542_v52, %v899_v18  ;;  %v511_v16 = vsel %vm392_vm7, %v508_v61, %v510_v17  ;;  %v531_v34 = vrot.slane %v524_v19, 2 }
  0xc8   :  { %v553_v4 = vsel %vm392_vm7, %v550_v0, %v552_v42  ;;  %v115_v7 = vadd.f32 %v113_v54, %v101_v44 }
  0xcb   :  { %376 = vrot.lane.b32.xlu0 %v373_v31, %s846_s17  ;;  %357 = vrot.lane.b32.xlu1 %v354_v41, %s846_s17  ;;  %v549_v31 = vrot.slane %v543_v22, 2  ;;  %v532_v41 = vsel %vm392_vm7, %v529_v14, %v531_v34 }
  0xcd   :  { %v551_v37 = vsel %vm392_vm7, %v549_v31, %v550_v0 }
  0xcf   :  { %449 = vrot.lane.b32.xlu0 %v446_v8, %s845_s6  ;;  %378 = vrot.lane.b32.xlu1 %v375_v35, %s846_s17  ;;  %v99_v8 = vstv %s98_s26  ;;  %v107_v35 = vmul.f32 %v105_v29, %v915_v24 }
  0xd0   :  { %v108_v49 = vadd.f32 %v106_v21, %v99_v8 }
  0xd1   :  { %v109_v46 = vadd.f32 %v107_v35, %v99_v8 }
  0xd3   :  { %470 = vrot.lane.b32.xlu0 %v467_v15, %s845_s6  ;;  %451 = vrot.lane.b32.xlu1 %v448_v32, %s845_s6 }
  0xd7   :  { %491 = vrot.lane.b32.xlu0 %v488_v58, %s845_s6  ;;  %472 = vrot.lane.b32.xlu1 %v469_v63, %s845_s6  ;;  %v103_v58 = vstv %s1184_s29 }
  0xd8   :  { %v120_v9 = vadd.f32 %v118_v55, %v103_v58  ;;  %v121_v20 = vadd.f32 %v119_v1, %v103_v58 }
  0xdb   :  { %512 = vrot.lane.b32.xlu0 %v509_v10, %s846_s17  ;;  %493 = vrot.lane.b32.xlu1 %v490_v13, %s845_s6  ;;  %s810_s6 = scalar_lea.vmem %s694_s5, 1536 }
  0xdc   :  { %p811_p10 = scmp.ne.s32.totalorder %s694_s5, %s810_s6  ;;  %p816_p12 = scmp.lt.s32.totalorder %s810_s6, %s810_s6 }
  0xde   :  { %p817_p13 = por %p816_p12, %p815_p11 }
  0xdf   :  { %533 = vrot.lane.b32.xlu0 %v530_v28, %s846_s17  ;;  %514 = vrot.lane.b32.xlu1 %v511_v16, %s846_s17 }
  0xe0   :  { %p818_p0 = pnand %p817_p13, %p811_p10 }
  0xe3   :  { %554 = vrot.lane.b32.xlu0 %v551_v37, %s846_s17  ;;  %535 = vrot.lane.b32.xlu1 %v532_v41, %s846_s17 }
  0xe7   :  { %556 = vrot.lane.b32.xlu1 %v553_v4, %s846_s17 }
 0x111   :  { %v129_v39 = vpop.permute.xlu0 %128 }
 0x112   :  { %v134_v51 = vadd.f32 %v129_v39, %v108_v49 }
 0x115   :  { %v131_v33 = vpop.permute.xlu1 %130  ;;  %v143_v43 = vpop.permute.xlu0 %142 }
 0x116   :  { %v135_v61 = vadd.f32 %v131_v33, %v109_v46  ;;  %v148_v62 = vadd.f32 %v143_v43, %v114_v53 }
 0x119   :  { %v145_v36 = vpop.permute.xlu1 %144  ;;  %v157_v45 = vpop.permute.xlu0 %156 }
 0x11a   :  { %v149_v12 = vadd.f32 %v145_v36, %v115_v7  ;;  %v162_v13 = vadd.f32 %v157_v45, %v120_v9 }
 0x11d   :  { %v159_v15 = vpop.permute.xlu1 %158  ;;  %v171_v32 = vpop.permute.xlu0 %170 }
 0x11e   :  { %v176_v57 = vadd.f32 %v171_v32, %v134_v51 }
 0x120   :  { %v222_v63 = vadd.f32 %v1057_v56, %v176_v57  ;;  %v163_v56 = vadd.f32 %v159_v15, %v121_v20 }
 0x121   :  { %v173_v2 = vpop.permute.xlu1 %172  ;;  %v185_v3 = vpop.permute.xlu0 %184 }
 0x122   :  { %v177_v52 = vadd.f32 %v173_v2, %v135_v61  ;;  %v190_v10 = vadd.f32 %v185_v3, %v148_v62 }
 0x124   :  { %v223_v14 = vadd.f32 %v1060_v47, %v177_v52  ;;  %v239_v18 = vadd.f32 %v1063_v60, %v190_v10 }
 0x125   :  { %v187_v17 = vpop.permute.xlu1 %186  ;;  %v199_v19 = vpop.permute.xlu0 %198 }
 0x126   :  { %v191_v22 = vadd.f32 %v187_v17, %v149_v12  ;;  %v204_v0 = vadd.f32 %v199_v19, %v162_v13 }
 0x128   :  { %v240_v24 = vadd.f32 %v1068_v48, %v191_v22  ;;  %v256_v28 = vadd.f32 %v1079_v5, %v204_v0 }
 0x129   :  { %v201_v16 = vpop.permute.xlu1 %200  ;;  %v272_v34 = vpop.permute.xlu0 %271 }
 0x12a   :  { %v205_v59 = vadd.f32 %v201_v16, %v163_v56  ;;  %v277_v60 = vadd.f32 %v272_v34, %v222_v63 }
 0x12c   :  { %v257_v31 = vadd.f32 %v1082_v6, %v205_v59 }
 0x12d   :  { %v274_v37 = vpop.permute.xlu1 %273  ;;  %v293_v41 = vpop.permute.xlu0 %292 }
 0x12e   :  { %v278_v33 = vadd.f32 %v274_v37, %v223_v14  ;;  %v298_v43 = vadd.f32 %v293_v41, %v239_v18 }
 0x131   :  { %v295_v47 = vpop.permute.xlu1 %294  ;;  %v314_v42 = vpop.permute.xlu0 %313 }
 0x132   :  { %v299_v35 = vadd.f32 %v295_v47, %v240_v24  ;;  %v319_v36 = vadd.f32 %v314_v42, %v256_v28 }
 0x135   :  { %v316_v4 = vpop.permute.xlu1 %315  ;;  %v335_v39 = vpop.permute.xlu0 %334 }
 0x136   :  { %v340_v29 = vadd.f32 %v335_v39, %v277_v60  ;;  %v320_v51 = vadd.f32 %v316_v4, %v257_v31 }
 0x138   :  { %v400_v21 = vadd.f32 %v1100_v23, %v340_v29 }
 0x139   :  { %v337_v48 = vpop.permute.xlu1 %336  ;;  %v356_v8 = vpop.permute.xlu0 %355 }
 0x13a   :  { %v341_v5 = vadd.f32 %v337_v48, %v278_v33  ;;  %v361_v26 = vadd.f32 %v356_v8, %v298_v43 }
 0x13c   :  { %v401_v6 = vadd.f32 %v1103_v25, %v341_v5  ;;  %v417_v45 = vadd.f32 %v1108_v27, %v361_v26 }
 0x13d   :  { %v358_v49 = vpop.permute.xlu1 %357  ;;  %v377_v30 = vpop.permute.xlu0 %376 }
 0x13e   :  { %v362_v44 = vadd.f32 %v358_v49, %v299_v35  ;;  %v382_v50 = vadd.f32 %v377_v30, %v319_v36 }
 0x140   :  { %v418_v46 = vadd.f32 %v1112_v11, %v362_v44  ;;  %v434_v15 = vadd.f32 %v1121_v38, %v382_v50 }
 0x141   :  { %v379_v23 = vpop.permute.xlu1 %378  ;;  %v450_v32 = vpop.permute.xlu0 %449 }
 0x142   :  { %v383_v53 = vadd.f32 %v379_v23, %v320_v51  ;;  %v455_v61 = vadd.f32 %v450_v32, %v400_v21 }
 0x144   :  { %v435_v54 = vadd.f32 %v1124_v40, %v383_v53 }
 0x145   :  { %v452_v55 = vpop.permute.xlu1 %451  ;;  %v471_v57 = vpop.permute.xlu0 %470 }
 0x146   :  { %v456_v1 = vadd.f32 %v452_v55, %v401_v6  ;;  %v476_v2 = vadd.f32 %v471_v57, %v417_v45 }
 0x149   :  { %v473_v58 = vpop.permute.xlu1 %472  ;;  %v492_v25 = vpop.permute.xlu0 %491 }
 0x14a   :  { %v477_v40 = vadd.f32 %v473_v58, %v418_v46  ;;  %v497_v10 = vadd.f32 %v492_v25, %v434_v15 }
 0x14d   :  { %v494_v27 = vpop.permute.xlu1 %493  ;;  %v513_v62 = vpop.permute.xlu0 %512 }
 0x14e   :  { %v1205_v63 = vadd.f32 %v513_v62, %v455_v61  ;;  %v498_v0 = vadd.f32 %v494_v27, %v435_v54 }
 0x150   :  { %v562_v11 = vmin.f32 %v1205_v63, 20.0  ;;  %vm582_vm9 = vcmp.gt.f32.partialorder %v1205_v63, 20.0 }
 0x151   :  { %v515_v3 = vpop.permute.xlu1 %514  ;;  %v534_v38 = vpop.permute.xlu0 %533 }
 0x152   :  { %v564_v7 = vmul.f32 1.442695, %v562_v11  ;;  %v1208_v9 = vadd.f32 %v515_v3, %v456_v1  ;;  %v1210_v52 = vadd.f32 %v534_v38, %v476_v2 }
 0x154   :  { %746 = vpow2.f32 %v564_v7  ;;  %v563_v12 = vmin.f32 %v1208_v9, 20.0  ;;  %v604_v13 = vmin.f32 %v1210_v52, 20.0  ;;  %vm583_vm10 = vcmp.gt.f32.partialorder %v1208_v9, 20.0 }
 0x155   :  { %v536_v14 = vpop.permute.xlu1 %535  ;;  %v555_v18 = vpop.permute.xlu0 %554  ;;  %vm624_vm11 = vcmp.gt.f32.partialorder %v1210_v52, 20.0 }
 0x156   :  { %v566_v17 = vmul.f32 1.442695, %v563_v12  ;;  %v606_v19 = vmul.f32 1.442695, %v604_v13  ;;  %v1214_v20 = vadd.f32 %v536_v14, %v477_v40  ;;  %v1216_v22 = vadd.f32 %v555_v18, %v497_v10 }
 0x158   :  { %748 = vpow2.f32 %v566_v17  ;;  %v605_v56 = vmin.f32 %v1214_v20, 20.0  ;;  %v646_v24 = vmin.f32 %v1216_v22, 20.0  ;;  %vm625_vm12 = vcmp.gt.f32.partialorder %v1214_v20, 20.0 }
 0x159   :  { %750 = vpow2.f32 %v606_v19  ;;  %v557_v28 = vpop.permute.xlu1 %556  ;;  %vm666_vm13 = vcmp.gt.f32.partialorder %v1216_v22, 20.0 }
 0x15a   :  { %v608_v16 = vmul.f32 1.442695, %v605_v56  ;;  %v648_v34 = vmul.f32 1.442695, %v646_v24  ;;  %v1220_v59 = vadd.f32 %v557_v28, %v498_v0 }
 0x15c   :  { %752 = vpow2.f32 %v608_v16  ;;  %v647_v31 = vmin.f32 %v1220_v59, 20.0  ;;  %vm667_vm14 = vcmp.gt.f32.partialorder %v1220_v59, 20.0 }
 0x15d   :  { %754 = vpow2.f32 %v648_v34 }
 0x15e   :  { %v650_v37 = vmul.f32 1.442695, %v647_v31 }
 0x160   :  { %756 = vpow2.f32 %v650_v37 }
 0x161   :  { %v747_v41 = vpop.eup %746 }
 0x162   :  { %v568_v47 = vadd.f32 2.0, %v747_v41 }
 0x164   :  { %v570_v42 = vmul.f32 %v747_v41, %v568_v47 }
 0x165   :  { %v749_v60 = vpop.eup %748 }
 0x166   :  { %v751_v4 = vpop.eup %750  ;;  %v572_v39 = vadd.f32 2.0, %v570_v42  ;;  %v569_v29 = vadd.f32 2.0, %v749_v60  ;;  %v584_v57 = vmul.f32 %v570_v42, %v1205_v63 }
 0x167   :  { %v610_v33 = vadd.f32 2.0, %v751_v4 }
 0x168   :  { %758 = vrcp.f32 %v572_v39  ;;  %v571_v43 = vmul.f32 %v749_v60, %v569_v29 }
 0x169   :  { %v753_v21 = vpop.eup %752  ;;  %v612_v48 = vmul.f32 %v751_v4, %v610_v33 }
 0x16a   :  { %v755_v8 = vpop.eup %754  ;;  %v573_v5 = vadd.f32 2.0, %v571_v43  ;;  %v611_v26 = vadd.f32 2.0, %v753_v21  ;;  %v585_v38 = vmul.f32 %v571_v43, %v1208_v9 }
 0x16b   :  { %v614_v35 = vadd.f32 2.0, %v612_v48  ;;  %v652_v36 = vadd.f32 2.0, %v755_v8  ;;  %v626_v10 = vmul.f32 %v612_v48, %v1210_v52 }
 0x16c   :  { %760 = vrcp.f32 %v573_v5  ;;  %v613_v6 = vmul.f32 %v753_v21, %v611_v26 }
 0x16d   :  { %v757_v45 = vpop.eup %756  ;;  %762 = vrcp.f32 %v614_v35  ;;  %v654_v49 = vmul.f32 %v755_v8, %v652_v36 }
 0x16e   :  { %v615_v30 = vadd.f32 2.0, %v613_v6  ;;  %v653_v44 = vadd.f32 2.0, %v757_v45  ;;  %v627_v56 = vmul.f32 %v613_v6, %v1214_v20 }
 0x16f   :  { %v656_v50 = vadd.f32 2.0, %v654_v49  ;;  %v668_v34 = vmul.f32 %v654_v49, %v1216_v22 }
 0x170   :  { %764 = vrcp.f32 %v615_v30  ;;  %v655_v51 = vmul.f32 %v757_v45, %v653_v44 }
 0x171   :  { %766 = vrcp.f32 %v656_v50 }
 0x172   :  { %v657_v46 = vadd.f32 2.0, %v655_v51  ;;  %v669_v42 = vmul.f32 %v655_v51, %v1220_v59 }
 0x174   :  { %768 = vrcp.f32 %v657_v46 }
 0x175   :  { %v759_v15 = vpop.eup %758 }
 0x176   :  { %v576_v23 = vmul.f32 %v759_v15, %v572_v39 }
 0x178   :  { %v578_v32 = vsub.f32 2.0, %v576_v23 }
 0x179   :  { %v761_v53 = vpop.eup %760 }
 0x17a   :  { %v763_v54 = vpop.eup %762  ;;  %v580_v55 = vmul.f32 %v759_v15, %v578_v32  ;;  %v577_v58 = vmul.f32 %v761_v53, %v573_v5 }
 0x17b   :  { %v618_v25 = vmul.f32 %v763_v54, %v614_v35 }
 0x17c   :  { %v586_v61 = vmul.f32 %v584_v57, %v580_v55  ;;  %v579_v27 = vsub.f32 2.0, %v577_v58 }
 0x17d   :  { %v765_v62 = vpop.eup %764  ;;  %v620_v1 = vsub.f32 2.0, %v618_v25 }
 0x17e   :  { %v767_v2 = vpop.eup %766  ;;  %v588_v11 = vsel %vm582_vm9, %v1205_v63, %v586_v61  ;;  %v581_v3 = vmul.f32 %v761_v53, %v579_v27  ;;  %v619_v7 = vmul.f32 %v765_v62, %v615_v30 }
 0x17f   :  { %595 = vrot.lane.b32.xlu0 %v588_v11, %s847_s30  ;;  %591 = vst.msk [vmem:[#allocation9] sm:$0xff] %vm590_vm8, %v588_v11  ;;  %v622_v40 = vmul.f32 %v763_v54, %v620_v1  ;;  %v660_v12 = vmul.f32 %v767_v2, %v656_v50 }
 0x180   :  { %v587_v13 = vmul.f32 %v585_v38, %v581_v3  ;;  %v621_v14 = vsub.f32 2.0, %v619_v7 }
 0x181   :  { %v769_v18 = vpop.eup %768  ;;  %v628_v63 = vmul.f32 %v626_v10, %v622_v40  ;;  %v662_v17 = vsub.f32 2.0, %v660_v12 }
 0x182   :  { %v589_v19 = vsel %vm583_vm10, %v1208_v9, %v587_v13  ;;  %v623_v0 = vmul.f32 %v765_v62, %v621_v14  ;;  %v661_v24 = vmul.f32 %v769_v18, %v657_v46 }
 0x183   :  { %597 = vrot.lane.b32.xlu1 %v589_v19, %s847_s30  ;;  %592 = vst.msk [vmem:[#allocation9 + $0x8] sm:$0xff] %vm590_vm8, %v589_v19  ;;  %v630_v28 = vsel %vm624_vm11, %v1210_v52, %v628_v63  ;;  %v664_v16 = vmul.f32 %v767_v2, %v662_v17 }
 0x184   :  { %637 = vrot.lane.b32.xlu0 %v630_v28, %s847_s30  ;;  %633 = vst.msk [vmem:[#allocation9 + $0x10] sm:$0xff] %vm590_vm8, %v630_v28  ;;  %v629_v31 = vmul.f32 %v627_v56, %v623_v0  ;;  %v663_v37 = vsub.f32 2.0, %v661_v24 }
 0x185   :  { %v670_v9 = vmul.f32 %v668_v34, %v664_v16 }
 0x186   :  { %v631_v41 = vsel %vm625_vm12, %v1214_v20, %v629_v31  ;;  %v665_v47 = vmul.f32 %v769_v18, %v663_v37 }
 0x187   :  { %634 = vst.msk [vmem:[#allocation9 + $0x18] sm:$0xff] %vm590_vm8, %v631_v41  ;;  %639 = vrot.lane.b32.xlu1 %v631_v41, %s847_s30  ;;  %v672_v52 = vsel %vm666_vm13, %v1216_v22, %v670_v9 }
 0x188   :  { %679 = vrot.lane.b32.xlu0 %v672_v52, %s847_s30  ;;  %675 = vst.msk [vmem:[#allocation9 + $0x20] sm:$0xff] %vm590_vm8, %v672_v52  ;;  %v671_v60 = vmul.f32 %v669_v42, %v665_v47 }
 0x18a   :  { %v673_v20 = vsel %vm667_vm14, %v1220_v59, %v671_v60 }
 0x18b   :  { %676 = vst.msk [vmem:[#allocation9 + $0x28] sm:$0xff] %vm590_vm8, %v673_v20  ;;  %681 = vrot.lane.b32.xlu1 %v673_v20, %s847_s30 }
 0x1f1   :  { %v596_v4 = vpop.permute.xlu0 %595 }
 0x1f2   :  { %602 = vst.msk [vmem:[#allocation9 + $0x30] sm:$0xff] %vm590_vm8, %v596_v4 }
 0x1f5   :  { %v598_v39 = vpop.permute.xlu1 %597 }
 0x1f6   :  { %603 = vst.msk [vmem:[#allocation9 + $0x38] sm:$0xff] %vm590_vm8, %v598_v39  ;;  %v638_v22 = vpop.permute.xlu0 %637 }
 0x1f7   :  { %644 = vst.msk [vmem:[#allocation9 + $0x40] sm:$0xff] %vm590_vm8, %v638_v22 }
 0x1f9   :  { %v640_v29 = vpop.permute.xlu1 %639 }
 0x1fa   :  { %645 = vst.msk [vmem:[#allocation9 + $0x48] sm:$0xff] %vm590_vm8, %v640_v29  ;;  %v680_v33 = vpop.permute.xlu0 %679 }
 0x1fb   :  { %686 = vst.msk [vmem:[#allocation9 + $0x50] sm:$0xff] %vm590_vm8, %v680_v33 }
 0x1fd   :  { %v682_v59 = vpop.permute.xlu1 %681 }
 0x1fe   :  { %687 = vst.msk [vmem:[#allocation9 + $0x58] sm:$0xff] %vm590_vm8, %v682_v59 }
 0x1ff   :  { %821 = shalt.err (!%p818_p0)
}
 0x200   :  { %699 = dma.vmem_to_hbm [thread:$0]  %s694_s5, 1536, %s1268_s3, [#allocation4], %s841_s0, %s841_s0, %s842_s1  }
 0x201   :  { %836 = dma.done.wait [#allocation4], 1536  }
 0x202   :  { %837 = vsyncadd [#allocation4], 4294965760 }
 0x203   :  { %703 = vsyncpa [#allocation3], 1 }
 0x204   :  { %704 = vsyncpa [#allocation4], 1 }
 0x205   :  { %705 = vsyncpa [#allocation5], 1 }
 0x206   :  { %706 = vsyncpa [#allocation6], 1 }

</bundles_post_ra>
